<compile_context>
chip_gen: v6e
topology: v6e:2x2x1
jax: 0.10.0
libtpu: 0.0.40
codegen_flags: <defaults>
</compile_context>

<pallas_src>
import functools

import jax
import jax.numpy as jnp
from jax import lax
from jax.experimental import pallas as pl
from jax.experimental.pallas import tpu as pltpu


# Raise the scoped-VMEM cap above the 16/32 MiB defaults while staying under the
# 64 MiB physical VMEM of v7x (v5e/v6e have 128 MiB physical).
VMEM_LIMIT_BYTES = 48 * 1024 * 1024


# -----------------------------------------------------------------------------
# helpers
# -----------------------------------------------------------------------------
def _round_up(x, m):
    return ((x + m - 1) // m) * m


def _pick_tile(m, cap=512):
    """Largest row tile (multiple of 8) dividing m."""
    for t in (512, 256, 128, 64, 32, 16, 8):
        if t <= cap and m % t == 0:
            return t
    return m


def _pack_gates(w, h, hp):
    """Reorder gates from PyTorch order (i,f,g,o) to (i,f,o,g) and zero-pad each
    gate to hp lanes.  The (i,f,o) sigmoids then act on one contiguous slab."""
    gi, gf, gg, go = (w[..., k * h:(k + 1) * h] for k in range(4))
    pad = [(0, 0)] * (w.ndim - 1) + [(0, hp - h)]
    return jnp.concatenate([jnp.pad(p, pad) for p in (gi, gf, go, gg)], axis=-1)


# -----------------------------------------------------------------------------
# Kernel 1: hoisted input projection — x is read ONCE for both directions.
#   [pregates_f | pregates_b] = x @ [Wih_f | Wih_b] + [b_f | b_b]
# -----------------------------------------------------------------------------
def input_proj_kernel(x_ref, w_ref, b_ref, of_ref, ob_ref, *, gn):
    acc = jnp.dot(x_ref[...], w_ref[...],
                  preferred_element_type=jnp.float32) + b_ref[...]
    of_ref[...] = acc[:, :gn]          # forward-direction pregates (f32)
    ob_ref[...] = acc[:, gn:]          # backward-direction pregates (f32)


def input_projection(x2d, w_cat, b_cat):
    M, E = x2d.shape
    N2 = w_cat.shape[1]
    gn = N2 // 2
    TM = _pick_tile(M)
    assert M % TM == 0 and TM % 8 == 0
    # TODO(synk): for large E (>=512) add a K grid axis + f32 accumulator scratch so
    # the double-buffered (TM,E)+(E,8Hp) working set stays inside the scoped-VMEM limit.
    kernel = functools.partial(input_proj_kernel, gn=gn)
    return pl.pallas_call(
        kernel,
        out_shape=(jax.ShapeDtypeStruct((M, gn), jnp.float32),
                   jax.ShapeDtypeStruct((M, gn), jnp.float32)),
        grid_spec=pltpu.PrefetchScalarGridSpec(
            num_scalar_prefetch=0,
            grid=(M // TM,),
            in_specs=[
                pl.BlockSpec((TM, E), lambda r: (r, 0)),
                pl.BlockSpec((E, N2), lambda r: (0, 0)),
                pl.BlockSpec((1, N2), lambda r: (0, 0)),
            ],
            out_specs=[pl.BlockSpec((TM, gn), lambda r: (r, 0)),
                       pl.BlockSpec((TM, gn), lambda r: (r, 0))],
        ),
        compiler_params=pltpu.CompilerParams(
            dimension_semantics=("parallel",),
            vmem_limit_bytes=VMEM_LIMIT_BYTES),
    )(x2d, w_cat, b_cat)


# -----------------------------------------------------------------------------
# Kernel 2: fused bidirectional LSTM recurrence, both directions in ONE time loop.
#   grid = (num_chunks,)  — sequential, h/c state carried in VMEM scratch.
#   Per step: fwd processes natural time t0_f + t (ascending),
#             bwd processes natural time t0_b + (chunk-1-t) (descending).
# -----------------------------------------------------------------------------
def bilstm_fused_kernel(pregf_ref, pregb_ref, len_ref, whhf_ref, whhb_ref,
                        houtf_ref, houtb_ref,
                        hf_sc, cf_sc, hb_sc, cb_sc,
                        *, chunk, hidden, nc, unroll):
    c = pl.program_id(0)

    @pl.when(c == 0)
    def _init():
        hf_sc[...] = jnp.zeros_like(hf_sc)
        cf_sc[...] = jnp.zeros_like(cf_sc)
        hb_sc[...] = jnp.zeros_like(hb_sc)
        cb_sc[...] = jnp.zeros_like(cb_sc)

    whh_f = whhf_ref[...]                     # (Hp, 4Hp) bf16, loop-invariant block
    whh_b = whhb_ref[...]
    # Hoist the (Bp, Hp) broadcast of the lengths out of the time loop: each step
    # then does a single vector compare, reused by all three selects.
    lens = jnp.broadcast_to(len_ref[...], (len_ref.shape[0], hidden))

    t0_f = c * chunk                          # forward natural-time chunk start
    t0_b = (nc - 1 - c) * chunk               # backward natural-time chunk start

    def cell(preg, h16, c32, whh):
        # preg already includes W_ih @ x + b (f32); h is carried in bf16 (MXU input).
        gates = preg + jnp.dot(h16, whh, preferred_element_type=jnp.float32)
        sig = jax.nn.sigmoid(gates[:, :3 * hidden])   # gate order (i,f,o,g): one slab
        i_g = sig[:, :hidden]
        f_g = sig[:, hidden:2 * hidden]
        o_g = sig[:, 2 * hidden:]
        g_g = jnp.tanh(gates[:, 3 * hidden:])
        c_new = f_g * c32 + i_g * g_g
        h_new = o_g * jnp.tanh(c_new)
        return h_new.astype(jnp.bfloat16), c_new

    def step(t, carry):
        hf, cf, hb, cb = carry

        # ---- forward direction ----
        hf_new, cf_new = cell(pregf_ref[t], hf, cf, whh_f)
        mf = lens > (t0_f + t)                # (Bp, Hp) bool
        houtf_ref[t] = jnp.where(mf, hf_new, jnp.zeros_like(hf_new))
        hf = jnp.where(mf, hf_new, hf)
        cf = jnp.where(mf, cf_new, cf)

        # ---- backward direction ----
        tb = chunk - 1 - t
        hb_new, cb_new = cell(pregb_ref[tb], hb, cb, whh_b)
        mb = lens > (t0_b + tb)
        houtb_ref[tb] = jnp.where(mb, hb_new, jnp.zeros_like(hb_new))
        hb = jnp.where(mb, hb_new, hb)
        cb = jnp.where(mb, cb_new, cb)

        return hf, cf, hb, cb

    carry0 = (hf_sc[...], cf_sc[...], hb_sc[...], cb_sc[...])
    hf, cf, hb, cb = lax.fori_loop(0, chunk, step, carry0, unroll=unroll)
    hf_sc[...] = hf
    cf_sc[...] = cf
    hb_sc[...] = hb
    cb_sc[...] = cb


def run_bilstm(pregf, pregb, len_b1, whh_f, whh_b, *, chunk):
    Lp, Bp, G4 = pregf.shape
    Hp = G4 // 4
    nc = Lp // chunk
    kernel = functools.partial(bilstm_fused_kernel, chunk=chunk, hidden=Hp,
                               nc=nc, unroll=min(8, chunk))
    return pl.pallas_call(
        kernel,
        out_shape=(jax.ShapeDtypeStruct((Lp, Bp, Hp), jnp.bfloat16),
                   jax.ShapeDtypeStruct((Lp, Bp, Hp), jnp.bfloat16)),
        grid_spec=pltpu.PrefetchScalarGridSpec(
            num_scalar_prefetch=0,
            grid=(nc,),
            in_specs=[
                # pregates: fwd chunk c (ascending), bwd chunk nc-1-c (descending)
                pl.BlockSpec((chunk, Bp, G4), lambda c: (c, 0, 0)),
                pl.BlockSpec((chunk, Bp, G4), lambda c: (nc - 1 - c, 0, 0)),
                # lengths + recurrent weights: constant block index -> DMA'd once.
                # TODO(synk): on v7x with large Hp, single-buffer these loop-invariant
                # blocks (pipeline_mode=pl.Buffered(1)) to halve their VMEM footprint.
                pl.BlockSpec((Bp, 1), lambda c: (0, 0)),
                pl.BlockSpec((Hp, G4), lambda c: (0, 0)),
                pl.BlockSpec((Hp, G4), lambda c: (0, 0)),
            ],
            out_specs=[
                pl.BlockSpec((chunk, Bp, Hp), lambda c: (c, 0, 0)),
                pl.BlockSpec((chunk, Bp, Hp), lambda c: (nc - 1 - c, 0, 0)),
            ],
            scratch_shapes=[pltpu.VMEM((Bp, Hp), jnp.bfloat16),   # h fwd (bf16 MXU input)
                            pltpu.VMEM((Bp, Hp), jnp.float32),    # c fwd
                            pltpu.VMEM((Bp, Hp), jnp.bfloat16),   # h bwd
                            pltpu.VMEM((Bp, Hp), jnp.float32)],   # c bwd
        ),
        compiler_params=pltpu.CompilerParams(
            dimension_semantics=("arbitrary",),
            vmem_limit_bytes=VMEM_LIMIT_BYTES),
    )(pregf, pregb, len_b1, whh_f, whh_b)


# -----------------------------------------------------------------------------
# Kernel 3: emission projection (fwd/bwd halves kept separate, no concat/transpose)
#   out = hf @ Wf + hb @ Wb + b    (hf/hb arrive in bf16)
# -----------------------------------------------------------------------------
def emission_kernel(hf_ref, hb_ref, wf_ref, wb_ref, b_ref, o_ref):
    acc = (jnp.dot(hf_ref[...], wf_ref[...], preferred_element_type=jnp.float32)
           + jnp.dot(hb_ref[...], wb_ref[...], preferred_element_type=jnp.float32)
           + b_ref[...])
    o_ref[...] = acc


def run_emission(hf, hb, wf, wb, b_lin):
    M, Hp = hf.shape
    Op = wf.shape[1]
    TM = _pick_tile(M)
    assert M % TM == 0 and TM % 8 == 0
    return pl.pallas_call(
        emission_kernel,
        out_shape=jax.ShapeDtypeStruct((M, Op), jnp.float32),
        grid_spec=pltpu.PrefetchScalarGridSpec(
            num_scalar_prefetch=0,
            grid=(M // TM,),
            in_specs=[
                pl.BlockSpec((TM, Hp), lambda r: (r, 0)),
                pl.BlockSpec((TM, Hp), lambda r: (r, 0)),
                pl.BlockSpec((Hp, Op), lambda r: (0, 0)),
                pl.BlockSpec((Hp, Op), lambda r: (0, 0)),
                pl.BlockSpec((1, Op), lambda r: (0, 0)),
            ],
            out_specs=pl.BlockSpec((TM, Op), lambda r: (r, 0)),
        ),
        compiler_params=pltpu.CompilerParams(
            dimension_semantics=("parallel",),
            vmem_limit_bytes=VMEM_LIMIT_BYTES),
    )(hf, hb, wf, wb, b_lin)


# -----------------------------------------------------------------------------
# Full forward
# -----------------------------------------------------------------------------
def bilstm_crf_forward(sents, lengths, params, *, chunk=64):
    B, L = sents.shape
    E = params["emb"].shape[1]
    H = params["whh_f"].shape[0]
    O = params["trans"].shape[0]

    Hp = _round_up(H, 128)          # lane-aligned hidden
    Op = _round_up(O, 128)          # lane-aligned labels
    Bp = _round_up(B, 8)            # sublane-aligned batch
    # NOTE(perf): with tiny batches the per-step (Bp,Hp)x(Hp,4Hp) matmul is latency
    # bound (M-utilisation Bp/128..256); pack B toward 128-256 if the workload allows.
    Lp = _round_up(L, chunk)
    nc = Lp // chunk
    assert Lp % chunk == 0 and nc >= 1

    # --- pad inputs (padded rows/steps are fully masked by length==0 / t>=len) ---
    sents_p = jnp.pad(sents, ((0, Bp - B), (0, Lp - L)))
    lens_p = jnp.pad(lengths.astype(jnp.int32), (0, Bp - B))
    len_b1 = lens_p.reshape(Bp, 1)

    # time-major bf16 embedding gather: bf16 halves the dominant kernel-1 read bytes.
    emb_bf = params["emb"].astype(jnp.bfloat16)
    x_lbe = jnp.take(emb_bf, jnp.transpose(sents_p), axis=0)          # (Lp, Bp, E) bf16

    # --- pad / pack weights (would be preprocessed once in production) ---
    # Gates reordered to (i, f, o, g); per-gate zero padding to Hp lanes.
    wih = jnp.concatenate([_pack_gates(params["wih_f"], H, Hp),
                           _pack_gates(params["wih_b"], H, Hp)],
                          axis=-1).astype(jnp.bfloat16)               # (E, 8Hp)
    bih = jnp.concatenate([_pack_gates(params["b_f"], H, Hp),
                           _pack_gates(params["b_b"], H, Hp)], axis=-1)  # (1, 8Hp) f32
    whh_f = _pack_gates(jnp.pad(params["whh_f"], ((0, Hp - H), (0, 0))),
                        H, Hp).astype(jnp.bfloat16)                   # (Hp, 4Hp)
    whh_b = _pack_gates(jnp.pad(params["whh_b"], ((0, Hp - H), (0, 0))),
                        H, Hp).astype(jnp.bfloat16)
    w_lin = params["w_lin"]
    wf = jnp.pad(w_lin[:H], ((0, Hp - H), (0, Op - O))).astype(jnp.bfloat16)   # (Hp,Op)
    wb = jnp.pad(w_lin[H:2 * H], ((0, Hp - H), (0, Op - O))).astype(jnp.bfloat16)
    b_lin = jnp.pad(params["b_lin"], ((0, 0), (0, Op - O)))                    # (1, Op)

    # --- kernel 1: hoisted input projection, x read ONCE for both directions ---
    # Pregates kept in f32 (per review: avoids bf16 rounding of the gate pre-acts
    # feeding the recurrence; they are added to an f32 accumulator anyway).
    x2 = x_lbe.reshape(Lp * Bp, E)
    pregf, pregb = input_projection(x2, wih, bih)                     # 2 x (Lp*Bp, 4Hp)
    pregf = pregf.reshape(Lp, Bp, 4 * Hp)
    pregb = pregb.reshape(Lp, Bp, 4 * Hp)

    # --- kernel 2: both directions fused into one serial time loop ---
    hout_f, hout_b = run_bilstm(pregf, pregb, len_b1, whh_f, whh_b, chunk=chunk)

    # --- kernel 3: emission projection (bf16 h, contiguous reshapes only) ---
    em = run_emission(hout_f.reshape(Lp * Bp, Hp), hout_b.reshape(Lp * Bp, Hp),
                      wf, wb, b_lin)                                  # (Lp*Bp, Op) f32
    em = em.reshape(Lp, Bp, Op)[:L, :B, :O]                           # (L, B, O)
    em = jnp.transpose(em, (1, 0, 2))                                 # (B, L, O) (tiny)

    # CRF transition broadcast-add kept in XLA (lane-dense path per perf review).
    crf = em[:, :, None, :] + params["trans"][None, None, :, :]       # (B, L, O, O)
    return crf


# -----------------------------------------------------------------------------
# Pure-JAX f32 reference (for correctness check).
# -----------------------------------------------------------------------------
def _lstm_dir_ref(x_lbe, lengths, wih, whh, b, reverse):
    L, B, _ = x_lbe.shape
    H = whh.shape[0]
    h = jnp.zeros((B, H), jnp.float32)
    c = jnp.zeros((B, H), jnp.float32)
    outs = [None] * L
    order = range(L - 1, -1, -1) if reverse else range(L)
    for t in order:
        gates = x_lbe[t] @ wih + h @ whh + b
        i_g = jax.nn.sigmoid(gates[:, :H])
        f_g = jax.nn.sigmoid(gates[:, H:2 * H])
        g_g = jnp.tanh(gates[:, 2 * H:3 * H])
        o_g = jax.nn.sigmoid(gates[:, 3 * H:])
        c_new = f_g * c + i_g * g_g
        h_new = o_g * jnp.tanh(c_new)
        mask = lengths[:, None] > t
        h = jnp.where(mask, h_new, h)
        c = jnp.where(mask, c_new, c)
        outs[t] = jnp.where(mask, h_new, 0.0)
    return jnp.stack(outs, axis=0)


def reference_forward(sents, lengths, params):
    emb = jnp.take(params["emb"], sents, axis=0)
    x_lbe = jnp.transpose(emb, (1, 0, 2))
    hf = _lstm_dir_ref(x_lbe, lengths, params["wih_f"], params["whh_f"],
                       params["b_f"], False)
    hb = _lstm_dir_ref(x_lbe, lengths, params["wih_b"], params["whh_b"],
                       params["b_b"], True)
    rnn_blh = jnp.transpose(jnp.concatenate([hf, hb], axis=-1), (1, 0, 2))
    emission = rnn_blh @ params["w_lin"] + params["b_lin"][0]
    return emission[:, :, None, :] + params["trans"][None, None, :, :]


if __name__ == "__main__":
    # Small, deterministic problem sizes.
    VOCAB, EMB, HID, OUT = 50, 16, 32, 8
    B, L = 2, 8

    key = jax.random.PRNGKey(0)
    ks = jax.random.split(key, 12)

    params = {
        "emb":   jax.random.normal(ks[0], (VOCAB, EMB), jnp.float32) * 0.1,
        "wih_f": jax.random.normal(ks[1], (EMB, 4 * HID), jnp.float32) * 0.1,
        "whh_f": jax.random.normal(ks[2], (HID, 4 * HID), jnp.float32) * 0.1,
        "b_f":   jax.random.normal(ks[3], (1, 4 * HID), jnp.float32) * 0.1,
        "wih_b": jax.random.normal(ks[4], (EMB, 4 * HID), jnp.float32) * 0.1,
        "whh_b": jax.random.normal(ks[5], (HID, 4 * HID), jnp.float32) * 0.1,
        "b_b":   jax.random.normal(ks[6], (1, 4 * HID), jnp.float32) * 0.1,
        "w_lin": jax.random.normal(ks[7], (2 * HID, OUT), jnp.float32) * 0.1,
        "b_lin": jax.random.normal(ks[8], (1, OUT), jnp.float32) * 0.1,
        # nn.Parameter(torch.ones(O, O) / O)
        "trans": jnp.ones((OUT, OUT), jnp.float32) / OUT,
    }

    sents = jax.random.randint(ks[9], (B, L), 0, VOCAB, dtype=jnp.int32)
    lengths = jnp.array([L, 5], dtype=jnp.int32)   # sorted descending (packed-style)

    # chunk=4 so the test exercises chunked state carry in both directions (L=8 -> 2 chunks).
    crf_scores = bilstm_crf_forward(sents, lengths, params, chunk=4)
    crf_scores = jax.block_until_ready(crf_scores)

    ref = reference_forward(sents, lengths, params)
    assert crf_scores.shape == (B, L, OUT, OUT)
    # bf16 matmul inputs / bf16 h with f32 accumulation -> loosened tolerance.
    assert jnp.allclose(crf_scores, ref, rtol=1e-2, atol=1e-2), (
        "mismatch vs pure-JAX reference")

    print("KERNEL_OK")
</pallas_src>

<mosaic_0001>
module attributes {stable_mosaic.version = 11 : i64} {
  func.func @input_proj_kernel(%arg0: i32, %arg1: memref<64x16xbf16, #tpu.memory_space<vmem>>, %arg2: memref<16x1024xbf16, #tpu.memory_space<vmem>>, %arg3: memref<1x1024xf32, #tpu.memory_space<vmem>>, %arg4: memref<64x512xf32, #tpu.memory_space<vmem>>, %arg5: memref<64x512xf32, #tpu.memory_space<vmem>>) attributes {dimension_semantics = [#tpu.dimension_semantics<parallel>], iteration_bounds = array<i64: 1>, scalar_prefetch = 0 : i64, scratch_operands = 0 : i64, tpu.core_type = #tpu.core_type<tc>, window_params = [{transform_indices = @transform_0, window_bounds = array<i64: 64, 16>}, {pipeline_mode = #tpu.pipeline_mode<synchronous>, transform_indices = @transform_1, window_bounds = array<i64: 16, 1024>}, {pipeline_mode = #tpu.pipeline_mode<synchronous>, transform_indices = @transform_2, window_bounds = array<i64: 1, 1024>}, {transform_indices = @transform_3, window_bounds = array<i64: 64, 512>}, {transform_indices = @transform_4, window_bounds = array<i64: 64, 512>}]} {
    %c0 = arith.constant 0 : index
    %c0_0 = arith.constant 0 : index
    %0 = vector.load %arg1[%c0, %c0_0] : memref<64x16xbf16, #tpu.memory_space<vmem>>, vector<64x16xbf16>
    %c0_1 = arith.constant 0 : index
    %c0_2 = arith.constant 0 : index
    %1 = vector.load %arg2[%c0_1, %c0_2] : memref<16x1024xbf16, #tpu.memory_space<vmem>>, vector<16x1024xbf16>
    %cst = arith.constant dense<0.000000e+00> : vector<64x1024xf32>
    %2 = tpu.matmul %0, %1, %cst {dimension_numbers = #tpu.dot_dimension_numbers<[1], [0], [0], [1], [0, 0, 1, 1], [], []>} : vector<64x16xbf16>, vector<16x1024xbf16>, vector<64x1024xf32> -> vector<64x1024xf32>
    %c0_3 = arith.constant 0 : index
    %c0_4 = arith.constant 0 : index
    %3 = vector.load %arg3[%c0_3, %c0_4] : memref<1x1024xf32, #tpu.memory_space<vmem>>, vector<1x1024xf32>
    %4 = vector.broadcast %3 : vector<1x1024xf32> to vector<64x1024xf32>
    %5 = arith.addf %2, %4 : vector<64x1024xf32>
    %6 = vector.extract_strided_slice %5 {offsets = [0, 0], sizes = [64, 512], strides = [1, 1]} : vector<64x1024xf32> to vector<64x512xf32>
    %c0_5 = arith.constant 0 : index
    %c0_6 = arith.constant 0 : index
    %7 = vector.load %arg4[%c0_5, %c0_6] : memref<64x512xf32, #tpu.memory_space<vmem>>, vector<64x512xf32>
    tpu.vector_store %arg4[%c0_5, %c0_6], %6 {strides = array<i32>} : memref<64x512xf32, #tpu.memory_space<vmem>>, vector<64x512xf32>,
    %8 = vector.extract_strided_slice %5 {offsets = [0, 512], sizes = [64, 512], strides = [1, 1]} : vector<64x1024xf32> to vector<64x512xf32>
    %c0_7 = arith.constant 0 : index
    %c0_8 = arith.constant 0 : index
    %9 = vector.load %arg5[%c0_7, %c0_8] : memref<64x512xf32, #tpu.memory_space<vmem>>, vector<64x512xf32>
    tpu.vector_store %arg5[%c0_7, %c0_8], %8 {strides = array<i32>} : memref<64x512xf32, #tpu.memory_space<vmem>>, vector<64x512xf32>,
    return
  }
  func.func @transform_0(%arg0: i32) -> (i32, i32) {
    %c0_i32 = arith.constant 0 : i32
    %c0_i32_0 = arith.constant 0 : i32
    return %arg0, %c0_i32 : i32, i32
  }
  func.func @transform_1(%arg0: i32) -> (i32, i32) {
    %c0_i32 = arith.constant 0 : i32
    %c0_i32_0 = arith.constant 0 : i32
    %c0_i32_1 = arith.constant 0 : i32
    return %c0_i32, %c0_i32_0 : i32, i32
  }
  func.func @transform_2(%arg0: i32) -> (i32, i32) {
    %c0_i32 = arith.constant 0 : i32
    %c0_i32_0 = arith.constant 0 : i32
    %c0_i32_1 = arith.constant 0 : i32
    return %c0_i32, %c0_i32_0 : i32, i32
  }
  func.func @transform_3(%arg0: i32) -> (i32, i32) {
    %c0_i32 = arith.constant 0 : i32
    %c0_i32_0 = arith.constant 0 : i32
    return %arg0, %c0_i32 : i32, i32
  }
  func.func @transform_4(%arg0: i32) -> (i32, i32) {
    %c0_i32 = arith.constant 0 : i32
    %c0_i32_0 = arith.constant 0 : i32
    return %arg0, %c0_i32 : i32, i32
  }
}

</mosaic_0001>

<bundles_post_ra>
// kernel: tpu_custom_call.1
= control target key start
LH: loop header
LB: loop body
LE: loop exit
PB: predicated region body
PF: predicated region fallthrough
CT: control target
= control target key end

     0   :  { %10 = vsyncpa [#allocation3], 0  ;;  %s837_s0 = inlined_call_operand.vmem [shape: bf16[64,16], index: 0, kind: input, shape index: {}]   ;;  %s838_s1 = inlined_call_operand.hbm [shape: bf16[16,1024], index: 1, kind: input, shape index: {}]   ;;  %s839_s2 = inlined_call_operand.vmem [shape: f32[1,1024], index: 2, kind: input, shape index: {}]   ;;  %s840_s3 = inlined_call_operand.hbm [shape: f32[64,512], index: 3, kind: output, shape index: {0}]   ;;  %s841_s4 = inlined_call_operand.hbm [shape: f32[64,512], index: 4, kind: output, shape index: {1}]  }
   0x1   :  { %11 = vsyncpa [#allocation4], 0 }
   0x2   :  { %12 = vsyncpa [#allocation7], 0  ;;  %s657_s15 = smov [#allocation2]  }
   0x3   :  { %s20_s16 = sshll.u32 %s657_s15, 4  ;;  %s21_s16 = int_to_ptr.vmem [resolvable:$true] %s20_s16 }
   0x4   :  { %s599_s17 = scalar_lea.vmem %s21_s16, 1024  ;;  %p604_p1 = scmp.lt.s32.totalorder %s21_s16, %s21_s16 }
   0x5   :  { %p600_p0 = scmp.ne.s32.totalorder %s21_s16, %s599_s17  ;;  %p605_p2 = scmp.lt.s32.totalorder %s599_s17, %s599_s17 }
   0x7   :  { %p606_p3 = por %p605_p2, %p604_p1 }
   0x9   :  { %p607_p4 = pnand %p606_p3, %p600_p0 }
   0xb   :  { %610 = shalt.err (!%p607_p4)
}
   0xc   :  { %s658_s18 = smov 512   ;;  %s659_s19 = smov 32  }
   0xd   :  { %26 = dma.hbm_to_vmem [thread:$0]  %s838_s1, 1024, %s21_s16, [#allocation3], %s658_s18, %s658_s18, %s659_s19  }
   0xe   :  { %651 = dma.done.wait [#allocation3], 1024  }
   0xf   :  { %652 = vsyncadd [#allocation3], 4294966272  ;;  %v660_v0 = vmov 0   ;;  %v41_v1 = vld [vmem:[#allocation2] sm:$0xff]  ;;  %v42_v3 = vld [vmem:[#allocation2 + $0x8] sm:$0xff]  ;;  %vm151_vm0 = vcmask 130048   ;;  %v51_v21 = vlaneseq }
  0x10   :  { %196 = vmatprep.mubr.bf16.mxu0 %v660_v0  ;;  %269 = vmatprep.mubr.bf16.mxu1 %v660_v0  ;;  %v45_v2 = vld [vmem:[#allocation2 + $0x20] sm:$0xff]  ;;  %v46_v5 = vld [vmem:[#allocation2 + $0x28] sm:$0xff]  ;;  %v43_v10 = vld [vmem:[#allocation2 + $0x10] sm:$0xff] }
  0x11   :  { %v558_v4 = vcombine.high %v41_v1, %v45_v2  ;;  %v557_v6 = vcombine.low %v41_v1, %v45_v2  ;;  %v560_v7 = vcombine.high %v42_v3, %v46_v5  ;;  %v559_v8 = vcombine.low %v42_v3, %v46_v5  ;;  %v587_v9 = vld [vmem:[%s837_s0] sm:$0xff]   ;;  %v47_v11 = vld [vmem:[#allocation2 + $0x30] sm:$0xff]  ;;  %v44_v13 = vld [vmem:[#allocation2 + $0x18] sm:$0xff] }
  0x12   :  { %v562_v12 = vcombine.high %v43_v10, %v47_v11  ;;  %v48_v14 = vld [vmem:[#allocation2 + $0x38] sm:$0xff]  ;;  %v561_v15 = vcombine.low %v43_v10, %v47_v11  ;;  %v588_v18 = vld [vmem:[%s837_s0 + $0x8] sm:$0xff]   ;;  %v589_v19 = vld [vmem:[%s837_s0 + $0x10] sm:$0xff]   ;;  %v722_v22 = vshrl.u32 %v51_v21, 7 }
  0x13   :  { %178 = vmatprep.subr.bf16.mxu0 %v558_v4  ;;  %251 = vmatprep.subr.bf16.mxu1 %v560_v7  ;;  %v564_v16 = vcombine.high %v44_v13, %v48_v14  ;;  %v563_v17 = vcombine.low %v44_v13, %v48_v14  ;;  %v590_v20 = vld [vmem:[%s837_s0 + $0x18] sm:$0xff]   ;;  %v728_v24 = vld [vmem:[%s839_s2] sm:$0xff]  ;;  %s661_s2 = smov [#allocation5]  }
  0x14   :  { %179 = vmatpush1.bf16.msra.mxu0 %v557_v6  ;;  %252 = vmatpush1.bf16.msra.mxu1 %v559_v8  ;;  %v53_v23 = vsub.s32 0, %v722_v22  ;;  %v61_v25 = vsub.s32 2, %v722_v22  ;;  %v57_v26 = vsub.s32 1, %v722_v22  ;;  %v65_v27 = vsub.s32 3, %v722_v22  ;;  %s525_s30 = sshll.u32 %s661_s2, 4  ;;  %s526_s30 = int_to_ptr.vmem [resolvable:$true] %s525_s30 }
  0x15   :  { %324 = vmatprep.subr.bf16.mxu0 %v562_v12  ;;  %397 = vmatprep.subr.bf16.mxu1 %v564_v16  ;;  %s611_s5 = scalar_lea.vmem %s526_s30, 4096  ;;  %p616_p6 = scmp.lt.s32.totalorder %s526_s30, %s526_s30 }
  0x16   :  { %v734_v28 = vrot.slane %v728_v24, %v53_v23  ;;  %v737_v29 = vrot.slane %v728_v24, %v61_v25  ;;  %v740_v30 = vrot.slane %v728_v24, %v57_v26  ;;  %v743_v32 = vrot.slane %v728_v24, %v65_v27  ;;  %p612_p5 = scmp.ne.s32.totalorder %s526_s30, %s611_s5  ;;  %p617_p7 = scmp.lt.s32.totalorder %s611_s5, %s611_s5 }
  0x17   :  { %565 = vmatmul.mubr.msk.bf16.vlgmr.msra.gmra.mxu0 %vm151_vm0, %v587_v9  ;;  %569 = vmatmul.mubr.msk.bf16.vlgmr.msra.gmra.mxu1 %vm151_vm0, %v587_v9  ;;  %v77_v23 = vsub.s32 6, %v722_v22  ;;  %v73_v27 = vsub.s32 5, %v722_v22 }
  0x18   :  { %325 = vmatpush1.bf16.msra.mxu0 %v561_v15  ;;  %398 = vmatpush1.bf16.msra.mxu1 %v563_v17  ;;  %p618_p8 = por %p617_p7, %p616_p6 }
  0x19   :  { %206 = vmatprep.mubr.bf16.mxu0 %v660_v0  ;;  %279 = vmatprep.mubr.bf16.mxu1 %v660_v0 }
  0x1a   :  { %p619_p9 = pnand %p618_p8, %p612_p5 }
  0x1f   :  { %566 = vmatmul.mubr.msk.bf16.gmra.mxu0 %vm151_vm0, %v588_v18  ;;  %570 = vmatmul.mubr.msk.bf16.gmra.mxu1 %vm151_vm0, %v588_v18 }
  0x20   :  { %216 = vmatprep.mubr.bf16.mxu0 %v660_v0  ;;  %289 = vmatprep.mubr.bf16.mxu1 %v660_v0 }
  0x27   :  { %567 = vmatmul.mubr.msk.bf16.gmra.mxu0 %vm151_vm0, %v589_v19  ;;  %571 = vmatmul.mubr.msk.bf16.gmra.mxu1 %vm151_vm0, %v589_v19 }
  0x28   :  { %226 = vmatprep.mubr.bf16.mxu0 %v660_v0  ;;  %299 = vmatprep.mubr.bf16.mxu1 %v660_v0 }
  0x2f   :  { %568 = vmatmul.mubr.msk.bf16.gmra.mxu0 %vm151_vm0, %v590_v20  ;;  %572 = vmatmul.mubr.msk.bf16.gmra.mxu1 %vm151_vm0, %v590_v20 }
  0x30   :  { %342 = vmatprep.mubr.bf16.mxu0 %v660_v0  ;;  %415 = vmatprep.mubr.bf16.mxu1 %v660_v0 }
  0x37   :  { %573 = vmatmul.mubr.msk.bf16.vlgmr.msra.gmra.mxu0 %vm151_vm0, %v587_v9  ;;  %577 = vmatmul.mubr.msk.bf16.vlgmr.msra.gmra.mxu1 %vm151_vm0, %v587_v9 }
  0x38   :  { %352 = vmatprep.mubr.bf16.mxu0 %v660_v0  ;;  %425 = vmatprep.mubr.bf16.mxu1 %v660_v0 }
  0x3f   :  { %574 = vmatmul.mubr.msk.bf16.gmra.mxu0 %vm151_vm0, %v588_v18  ;;  %578 = vmatmul.mubr.msk.bf16.gmra.mxu1 %vm151_vm0, %v588_v18 }
  0x40   :  { %362 = vmatprep.mubr.bf16.mxu0 %v660_v0  ;;  %435 = vmatprep.mubr.bf16.mxu1 %v660_v0 }
  0x47   :  { %575 = vmatmul.mubr.msk.bf16.gmra.mxu0 %vm151_vm0, %v589_v19  ;;  %579 = vmatmul.mubr.msk.bf16.gmra.mxu1 %vm151_vm0, %v589_v19  ;;  %v69_v19 = vsub.s32 4, %v722_v22 }
  0x48   :  { %372 = vmatprep.mubr.bf16.mxu0 %v660_v0  ;;  %445 = vmatprep.mubr.bf16.mxu1 %v660_v0 }
  0x4f   :  { %576 = vmatmul.mubr.msk.bf16.gmra.mxu0 %vm151_vm0, %v590_v20  ;;  %580 = vmatmul.mubr.msk.bf16.gmra.mxu1 %vm151_vm0, %v590_v20 }
  0xd7   :  { %v198_v31 = vpop.f32.mrf.mxu0  ;;  %v271_v34 = vpop.f32.mrf.mxu1 }
  0xd8   :  { %v199_v33 = vadd.f32 %v198_v31, %v734_v28  ;;  %v272_v35 = vadd.f32 %v271_v34, %v737_v29  ;;  %v81_v34 = vsub.s32 7, %v722_v22 }
  0xd9   :  { %v200_v36 = vpop.f32.mrf.mxu0  ;;  %v273_v38 = vpop.f32.mrf.mxu1 }
  0xda   :  { %456 = vst [vmem:[#allocation5] sm:$0xff] %v199_v33  ;;  %v201_v37 = vadd.f32 %v200_v36, %v740_v30  ;;  %458 = vst [vmem:[#allocation5 + $0x10] sm:$0xff] %v272_v35  ;;  %v274_v39 = vadd.f32 %v273_v38, %v743_v32 }
  0xdb   :  { %v202_v40 = vpop.f32.mrf.mxu0  ;;  %v275_v42 = vpop.f32.mrf.mxu1 }
  0xdc   :  { %457 = vst [vmem:[#allocation5 + $0x8] sm:$0xff] %v201_v37  ;;  %v203_v41 = vadd.f32 %v202_v40, %v734_v28  ;;  %459 = vst [vmem:[#allocation5 + $0x18] sm:$0xff] %v274_v39  ;;  %v276_v43 = vadd.f32 %v275_v42, %v737_v29  ;;  %v779_v37 = vrot.slane %v728_v24, %v69_v19 }
  0xdd   :  { %v204_v44 = vpop.f32.mrf.mxu0  ;;  %v277_v46 = vpop.f32.mrf.mxu1  ;;  %v783_v40 = vrot.slane %v728_v24, %v77_v23  ;;  %v787_v42 = vrot.slane %v728_v24, %v73_v27 }
  0xde   :  { %460 = vst [vmem:[#allocation5 + $0x20] sm:$0xff] %v203_v41  ;;  %v205_v45 = vadd.f32 %v204_v44, %v740_v30  ;;  %462 = vst [vmem:[#allocation5 + $0x30] sm:$0xff] %v276_v43  ;;  %v278_v47 = vadd.f32 %v277_v46, %v743_v32  ;;  %v791_v44 = vrot.slane %v728_v24, %v81_v34 }
  0xdf   :  { %v208_v48 = vpop.f32.mrf.mxu0  ;;  %v281_v50 = vpop.f32.mrf.mxu1 }
  0xe0   :  { %461 = vst [vmem:[#allocation5 + $0x28] sm:$0xff] %v205_v45  ;;  %v209_v49 = vadd.f32 %v208_v48, %v734_v28  ;;  %463 = vst [vmem:[#allocation5 + $0x38] sm:$0xff] %v278_v47  ;;  %v282_v51 = vadd.f32 %v281_v50, %v737_v29 }
  0xe1   :  { %v210_v52 = vpop.f32.mrf.mxu0  ;;  %v283_v54 = vpop.f32.mrf.mxu1 }
  0xe2   :  { %464 = vst [vmem:[#allocation5 + $0x40] sm:$0xff] %v209_v49  ;;  %v211_v53 = vadd.f32 %v210_v52, %v740_v30  ;;  %466 = vst [vmem:[#allocation5 + $0x50] sm:$0xff] %v282_v51  ;;  %v284_v55 = vadd.f32 %v283_v54, %v743_v32 }
  0xe3   :  { %v212_v56 = vpop.f32.mrf.mxu0  ;;  %v285_v58 = vpop.f32.mrf.mxu1 }
  0xe4   :  { %465 = vst [vmem:[#allocation5 + $0x48] sm:$0xff] %v211_v53  ;;  %v213_v57 = vadd.f32 %v212_v56, %v734_v28  ;;  %467 = vst [vmem:[#allocation5 + $0x58] sm:$0xff] %v284_v55  ;;  %v286_v59 = vadd.f32 %v285_v58, %v737_v29 }
  0xe5   :  { %v214_v60 = vpop.f32.mrf.mxu0  ;;  %v287_v62 = vpop.f32.mrf.mxu1 }
  0xe6   :  { %468 = vst [vmem:[#allocation5 + $0x60] sm:$0xff] %v213_v57  ;;  %v215_v61 = vadd.f32 %v214_v60, %v740_v30  ;;  %470 = vst [vmem:[#allocation5 + $0x70] sm:$0xff] %v286_v59  ;;  %v288_v63 = vadd.f32 %v287_v62, %v743_v32 }
  0xe7   :  { %v218_v0 = vpop.f32.mrf.mxu0  ;;  %v291_v2 = vpop.f32.mrf.mxu1 }
  0xe8   :  { %469 = vst [vmem:[#allocation5 + $0x68] sm:$0xff] %v215_v61  ;;  %v219_v1 = vadd.f32 %v218_v0, %v734_v28  ;;  %471 = vst [vmem:[#allocation5 + $0x78] sm:$0xff] %v288_v63  ;;  %v292_v3 = vadd.f32 %v291_v2, %v737_v29 }
  0xe9   :  { %v220_v4 = vpop.f32.mrf.mxu0  ;;  %v293_v6 = vpop.f32.mrf.mxu1 }
  0xea   :  { %472 = vst [vmem:[#allocation5 + $0x80] sm:$0xff] %v219_v1  ;;  %v221_v5 = vadd.f32 %v220_v4, %v740_v30  ;;  %474 = vst [vmem:[#allocation5 + $0x90] sm:$0xff] %v292_v3  ;;  %v294_v7 = vadd.f32 %v293_v6, %v743_v32 }
  0xeb   :  { %v222_v8 = vpop.f32.mrf.mxu0  ;;  %v295_v10 = vpop.f32.mrf.mxu1 }
  0xec   :  { %473 = vst [vmem:[#allocation5 + $0x88] sm:$0xff] %v221_v5  ;;  %v223_v9 = vadd.f32 %v222_v8, %v734_v28  ;;  %475 = vst [vmem:[#allocation5 + $0x98] sm:$0xff] %v294_v7  ;;  %v296_v11 = vadd.f32 %v295_v10, %v737_v29 }
  0xed   :  { %v224_v12 = vpop.f32.mrf.mxu0  ;;  %v297_v14 = vpop.f32.mrf.mxu1 }
  0xee   :  { %476 = vst [vmem:[#allocation5 + $0xa0] sm:$0xff] %v223_v9  ;;  %v225_v13 = vadd.f32 %v224_v12, %v740_v30  ;;  %478 = vst [vmem:[#allocation5 + $0xb0] sm:$0xff] %v296_v11  ;;  %v298_v15 = vadd.f32 %v297_v14, %v743_v32 }
  0xef   :  { %v228_v16 = vpop.f32.mrf.mxu0  ;;  %v301_v18 = vpop.f32.mrf.mxu1 }
  0xf0   :  { %477 = vst [vmem:[#allocation5 + $0xa8] sm:$0xff] %v225_v13  ;;  %v229_v17 = vadd.f32 %v228_v16, %v734_v28  ;;  %479 = vst [vmem:[#allocation5 + $0xb8] sm:$0xff] %v298_v15  ;;  %v302_v20 = vadd.f32 %v301_v18, %v737_v29 }
  0xf1   :  { %v230_v21 = vpop.f32.mrf.mxu0  ;;  %v303_v26 = vpop.f32.mrf.mxu1 }
  0xf2   :  { %480 = vst [vmem:[#allocation5 + $0xc0] sm:$0xff] %v229_v17  ;;  %v231_v25 = vadd.f32 %v230_v21, %v740_v30  ;;  %482 = vst [vmem:[#allocation5 + $0xd0] sm:$0xff] %v302_v20  ;;  %v304_v31 = vadd.f32 %v303_v26, %v743_v32 }
  0xf3   :  { %v232_v33 = vpop.f32.mrf.mxu0  ;;  %v305_v36 = vpop.f32.mrf.mxu1 }
  0xf4   :  { %481 = vst [vmem:[#allocation5 + $0xc8] sm:$0xff] %v231_v25  ;;  %v233_v35 = vadd.f32 %v232_v33, %v734_v28  ;;  %483 = vst [vmem:[#allocation5 + $0xd8] sm:$0xff] %v304_v31  ;;  %v306_v38 = vadd.f32 %v305_v36, %v737_v29 }
  0xf5   :  { %v234_v39 = vpop.f32.mrf.mxu0  ;;  %v307_v22 = vpop.f32.mrf.mxu1 }
  0xf6   :  { %484 = vst [vmem:[#allocation5 + $0xe0] sm:$0xff] %v233_v35  ;;  %v235_v41 = vadd.f32 %v234_v39, %v740_v30  ;;  %486 = vst [vmem:[#allocation5 + $0xf0] sm:$0xff] %v306_v38  ;;  %v308_v28 = vadd.f32 %v307_v22, %v743_v32 }
  0xf7   :  { %v344_v43 = vpop.f32.mrf.mxu0  ;;  %v417_v45 = vpop.f32.mrf.mxu1 }
  0xf8   :  { %485 = vst [vmem:[#allocation5 + $0xe8] sm:$0xff] %v235_v41  ;;  %v345_v29 = vadd.f32 %v344_v43, %v779_v37  ;;  %487 = vst [vmem:[#allocation5 + $0xf8] sm:$0xff] %v308_v28  ;;  %v418_v46 = vadd.f32 %v417_v45, %v783_v40 }
  0xf9   :  { %v346_v30 = vpop.f32.mrf.mxu0  ;;  %v419_v48 = vpop.f32.mrf.mxu1 }
  0xfa   :  { %488 = vst [vmem:[#allocation6] sm:$0xff] %v345_v29  ;;  %v347_v47 = vadd.f32 %v346_v30, %v787_v42 }
  0xfb   :  { %622 = shalt.err (!%p619_p9)
}
  0xfc   :  { %531 = dma.vmem_to_hbm [thread:$0]  %s526_s30, 4096, %s840_s3, [#allocation4], %s658_s18, %s658_s18, %s659_s19   ;;  %490 = vst [vmem:[#allocation6 + $0x10] sm:$0xff] %v418_v46  ;;  %v420_v24 = vadd.f32 %v419_v48, %v791_v44  ;;  %v348_v32 = vpop.f32.mrf.mxu0  ;;  %489 = vst [vmem:[#allocation6 + $0x8] sm:$0xff] %v347_v47  ;;  %v421_v50 = vpop.f32.mrf.mxu1 }
  0xfd   :  { %v349_v49 = vadd.f32 %v348_v32, %v779_v37  ;;  %v422_v51 = vadd.f32 %v421_v50, %v783_v40  ;;  %s662_s3 = smov [#allocation6]  }
  0xfe   :  { %491 = vst [vmem:[#allocation6 + $0x18] sm:$0xff] %v420_v24  ;;  %v350_v52 = vpop.f32.mrf.mxu0  ;;  %v423_v54 = vpop.f32.mrf.mxu1  ;;  %s537_s8 = sshll.u32 %s662_s3, 4  ;;  %s538_s8 = int_to_ptr.vmem [resolvable:$true] %s537_s8 }
  0xff   :  { %492 = vst [vmem:[#allocation6 + $0x20] sm:$0xff] %v349_v49  ;;  %v351_v53 = vadd.f32 %v350_v52, %v787_v42  ;;  %494 = vst [vmem:[#allocation6 + $0x30] sm:$0xff] %v422_v51  ;;  %v424_v55 = vadd.f32 %v423_v54, %v791_v44  ;;  %s631_s9 = scalar_lea.vmem %s538_s8, 4096  ;;  %p636_p11 = scmp.lt.s32.totalorder %s538_s8, %s538_s8 }
 0x100   :  { %v354_v56 = vpop.f32.mrf.mxu0  ;;  %v427_v58 = vpop.f32.mrf.mxu1  ;;  %p632_p10 = scmp.ne.s32.totalorder %s538_s8, %s631_s9  ;;  %p637_p12 = scmp.lt.s32.totalorder %s631_s9, %s631_s9 }
 0x101   :  { %493 = vst [vmem:[#allocation6 + $0x28] sm:$0xff] %v351_v53  ;;  %v355_v57 = vadd.f32 %v354_v56, %v779_v37  ;;  %495 = vst [vmem:[#allocation6 + $0x38] sm:$0xff] %v424_v55  ;;  %v428_v59 = vadd.f32 %v427_v58, %v783_v40 }
 0x102   :  { %v356_v60 = vpop.f32.mrf.mxu0  ;;  %v429_v62 = vpop.f32.mrf.mxu1  ;;  %p638_p13 = por %p637_p12, %p636_p11 }
 0x103   :  { %496 = vst [vmem:[#allocation6 + $0x40] sm:$0xff] %v355_v57  ;;  %v357_v61 = vadd.f32 %v356_v60, %v787_v42  ;;  %498 = vst [vmem:[#allocation6 + $0x50] sm:$0xff] %v428_v59  ;;  %v430_v63 = vadd.f32 %v429_v62, %v791_v44 }
 0x104   :  { %v358_v0 = vpop.f32.mrf.mxu0  ;;  %v431_v2 = vpop.f32.mrf.mxu1  ;;  %p639_p0 = pnand %p638_p13, %p632_p10 }
 0x105   :  { %497 = vst [vmem:[#allocation6 + $0x48] sm:$0xff] %v357_v61  ;;  %v359_v1 = vadd.f32 %v358_v0, %v779_v37  ;;  %499 = vst [vmem:[#allocation6 + $0x58] sm:$0xff] %v430_v63  ;;  %v432_v3 = vadd.f32 %v431_v2, %v783_v40 }
 0x106   :  { %v360_v4 = vpop.f32.mrf.mxu0  ;;  %v433_v6 = vpop.f32.mrf.mxu1 }
 0x107   :  { %500 = vst [vmem:[#allocation6 + $0x60] sm:$0xff] %v359_v1  ;;  %v361_v5 = vadd.f32 %v360_v4, %v787_v42  ;;  %502 = vst [vmem:[#allocation6 + $0x70] sm:$0xff] %v432_v3  ;;  %v434_v7 = vadd.f32 %v433_v6, %v791_v44 }
 0x108   :  { %v364_v8 = vpop.f32.mrf.mxu0  ;;  %v437_v10 = vpop.f32.mrf.mxu1 }
 0x109   :  { %501 = vst [vmem:[#allocation6 + $0x68] sm:$0xff] %v361_v5  ;;  %v365_v9 = vadd.f32 %v364_v8, %v779_v37  ;;  %503 = vst [vmem:[#allocation6 + $0x78] sm:$0xff] %v434_v7  ;;  %v438_v11 = vadd.f32 %v437_v10, %v783_v40 }
 0x10a   :  { %v366_v12 = vpop.f32.mrf.mxu0  ;;  %v439_v14 = vpop.f32.mrf.mxu1 }
 0x10b   :  { %504 = vst [vmem:[#allocation6 + $0x80] sm:$0xff] %v365_v9  ;;  %v367_v13 = vadd.f32 %v366_v12, %v787_v42  ;;  %506 = vst [vmem:[#allocation6 + $0x90] sm:$0xff] %v438_v11  ;;  %v440_v15 = vadd.f32 %v439_v14, %v791_v44 }
 0x10c   :  { %v368_v16 = vpop.f32.mrf.mxu0  ;;  %v441_v18 = vpop.f32.mrf.mxu1 }
 0x10d   :  { %505 = vst [vmem:[#allocation6 + $0x88] sm:$0xff] %v367_v13  ;;  %v369_v17 = vadd.f32 %v368_v16, %v779_v37  ;;  %507 = vst [vmem:[#allocation6 + $0x98] sm:$0xff] %v440_v15  ;;  %v442_v19 = vadd.f32 %v441_v18, %v783_v40 }
 0x10e   :  { %v370_v20 = vpop.f32.mrf.mxu0  ;;  %v443_v23 = vpop.f32.mrf.mxu1 }
 0x10f   :  { %508 = vst [vmem:[#allocation6 + $0xa0] sm:$0xff] %v369_v17  ;;  %v371_v21 = vadd.f32 %v370_v20, %v787_v42  ;;  %510 = vst [vmem:[#allocation6 + $0xb0] sm:$0xff] %v442_v19  ;;  %v444_v25 = vadd.f32 %v443_v23, %v791_v44 }
 0x110   :  { %v374_v26 = vpop.f32.mrf.mxu0  ;;  %v447_v31 = vpop.f32.mrf.mxu1 }
 0x111   :  { %509 = vst [vmem:[#allocation6 + $0xa8] sm:$0xff] %v371_v21  ;;  %v375_v27 = vadd.f32 %v374_v26, %v779_v37  ;;  %511 = vst [vmem:[#allocation6 + $0xb8] sm:$0xff] %v444_v25  ;;  %v448_v33 = vadd.f32 %v447_v31, %v783_v40 }
 0x112   :  { %v376_v34 = vpop.f32.mrf.mxu0  ;;  %v449_v36 = vpop.f32.mrf.mxu1 }
 0x113   :  { %512 = vst [vmem:[#allocation6 + $0xc0] sm:$0xff] %v375_v27  ;;  %v377_v35 = vadd.f32 %v376_v34, %v787_v42  ;;  %514 = vst [vmem:[#allocation6 + $0xd0] sm:$0xff] %v448_v33  ;;  %v450_v38 = vadd.f32 %v449_v36, %v791_v44 }
 0x114   :  { %v378_v39 = vpop.f32.mrf.mxu0  ;;  %v451_v22 = vpop.f32.mrf.mxu1 }
 0x115   :  { %513 = vst [vmem:[#allocation6 + $0xc8] sm:$0xff] %v377_v35  ;;  %v379_v41 = vadd.f32 %v378_v39, %v779_v37  ;;  %515 = vst [vmem:[#allocation6 + $0xd8] sm:$0xff] %v450_v38  ;;  %v452_v28 = vadd.f32 %v451_v22, %v783_v40 }
 0x116   :  { %v380_v43 = vpop.f32.mrf.mxu0  ;;  %v453_v45 = vpop.f32.mrf.mxu1 }
 0x117   :  { %516 = vst [vmem:[#allocation6 + $0xe0] sm:$0xff] %v379_v41  ;;  %v381_v29 = vadd.f32 %v380_v43, %v787_v42  ;;  %518 = vst [vmem:[#allocation6 + $0xf0] sm:$0xff] %v452_v28  ;;  %v454_v46 = vadd.f32 %v453_v45, %v791_v44 }
 0x119   :  { %517 = vst [vmem:[#allocation6 + $0xe8] sm:$0xff] %v381_v29  ;;  %519 = vst [vmem:[#allocation6 + $0xf8] sm:$0xff] %v454_v46 }
 0x11a   :  { %642 = shalt.err (!%p639_p0)
}
 0x11b   :  { %543 = dma.vmem_to_hbm [thread:$0]  %s538_s8, 4096, %s841_s4, [#allocation7], %s658_s18, %s658_s18, %s659_s19  }
 0x11c   :  { %653 = dma.done.wait [#allocation4], 4096  }
 0x11d   :  { %654 = vsyncadd [#allocation4], 4294963200 }
 0x11e   :  { %655 = dma.done.wait [#allocation7], 4096  }
 0x11f   :  { %656 = vsyncadd [#allocation7], 4294963200 }
 0x120   :  { %550 = vsyncpa [#allocation3], 1 }
 0x121   :  { %551 = vsyncpa [#allocation4], 1 }
 0x122   :  { %552 = vsyncpa [#allocation7], 1 }

</bundles_post_ra>
